<compile_context>
chip_gen: v5e
topology: v5e:2x2
jax: 0.10.0
libtpu: 0.0.40
codegen_flags: <defaults>
</compile_context>

<pallas_src>
import functools

import jax
import jax.numpy as jnp
from jax import lax
from jax.experimental import pallas as pl
from jax.experimental.pallas import tpu as pltpu

_BN_EPS = 1e-5
_TILE_BYTE_BUDGET = 4 * 1024 * 1024   # per-grid-step block budget (pre double-buffering)


def _vmem_limit_bytes():
    # v5e/v6e: 128 MiB physical VMEM, v7x: 64 MiB.  Use half the physical
    # capacity (per-generation limit), falling back to a safe 32 MiB.
    try:
        cap = pltpu.get_tpu_info().vmem_capacity_bytes
        return int(min(cap // 2, 96 * 1024 * 1024))
    except Exception:
        return 32 * 1024 * 1024


def _pick_batch_tile(n, per_elem_bytes, budget=_TILE_BYTE_BUDGET):
    """Largest divisor of n whose per-step block fits the byte budget (>= 1)."""
    # TODO(synk): also tile along the length axis (with a K-1 halo window) when
    # a single batch element exceeds the budget.
    best = 1
    for d in range(1, n + 1):
        if n % d == 0 and d * per_elem_bytes <= budget:
            best = d
    return best


# --------------------------- Pallas kernels ----------------------------------
def _make_compute_y(taps, b_tile, pout, c_out, lp):
    """In-kernel im2col: y[b, r, o, l] = sum_t W_t[o, c] * x[b, p_t, c, l + off_t].

    `taps` is a static list of (out_phase, in_phase, offset, weight_index).
    Operands are bf16 (or f32), accumulation is f32 on the MXU.
    """
    def compute_y(x_ref, w_ref):
        acc = [None] * pout
        for (r, p, off, wi) in taps:
            x_sl = x_ref[:, p, :, off:off + lp]                    # (B, C_in, Lp)
            w_t = jnp.broadcast_to(w_ref[wi][None],
                                   (b_tile,) + tuple(w_ref.shape[1:]))
            contrib = lax.dot_general(                             # (B, C_out, Lp) f32
                w_t, x_sl,
                dimension_numbers=(((2,), (1,)), ((0,), (0,))),
                preferred_element_type=jnp.float32)
            acc[r] = contrib if acc[r] is None else acc[r] + contrib
        outs = [a if a is not None else jnp.zeros((b_tile, c_out, lp), jnp.float32)
                for a in acc]
        return jnp.stack(outs, axis=1)                             # (B, Pout, C_out, Lp)
    return compute_y


def _make_stats_kernel(compute_y, inv_n_tile, tail_mask):
    """Phase 1: per-tile per-channel sum + sum of squared deviations (tile mean).

    Outputs are per-tile (parallel grid, combined in the wrapper via Chan's
    parallel-variance formula) -- megacore friendly and numerically robust.
    `tail_mask` = (q, Lp) masks the padded last column of short deconv phases.
    """
    def stats_kernel(x_ref, w_ref, s1_ref, m2_ref):
        y = compute_y(x_ref, w_ref)                                # (B,Pout,C_out,Lp) f32
        if tail_mask is not None:
            q, lp = tail_mask
            ip = lax.broadcasted_iota(jnp.int32, y.shape, 1)
            il = lax.broadcasted_iota(jnp.int32, y.shape, 3)
            mask = (il < jnp.where(ip < q, lp, lp - 1)).astype(y.dtype)
            ys = y * mask
        else:
            mask, ys = None, y
        s1 = jnp.sum(ys, axis=(0, 1, 3), keepdims=True)            # (1,1,C_out,1)
        d = y - s1 * inv_n_tile                                    # deviation from tile mean
        if mask is not None:
            d = d * mask
        m2 = jnp.sum(d * d, axis=(0, 1, 3), keepdims=True)
        s1_ref[...] = s1.reshape(1, 1, -1)
        m2_ref[...] = m2.reshape(1, 1, -1)
    return stats_kernel


def _make_apply_kernel(compute_y):
    """Phase 2: recompute conv (bit-identical to phase 1), folded BN FMA + ReLU,
    stored directly in the PyTorch NCL layout (length on lanes)."""
    def apply_kernel(x_ref, w_ref, scale_ref, shift_ref, o_ref):
        y = compute_y(x_ref, w_ref)
        sc = scale_ref[...].reshape(1, 1, -1, 1)
        sh = shift_ref[...].reshape(1, 1, -1, 1)
        o_ref[...] = jnp.maximum(y * sc + sh, 0.0).astype(o_ref.dtype)
    return apply_kernel


# ------------------------------- forward --------------------------------------
@functools.partial(jax.jit,
                   static_argnames=("kernel_size", "stride", "deconv", "compute_dtype"))
def conv_or_deconv_forward(x, weight, gamma, beta, *, kernel_size, stride,
                           deconv=False, compute_dtype=jnp.bfloat16):
    """Forward of ConvOrDeconv.  x: (N, C_in, L) f32 -> (N, C_out, L_out) f32."""
    N, C_in, L = x.shape
    K, S, P = kernel_size, stride, kernel_size // 2

    # ---- build the static tap program and the prepared (phase, chan, length)
    # ---- input.  taps: (out_phase, in_phase, offset, weight_index); weights
    # ---- are (C_out, C_in) matrices.  Single fused pad+cast(+reshape) pass.
    if not deconv:
        # nn.Conv1d weight: (C_out, C_in, K), padding=K//2, bias=False.
        C_out = weight.shape[0]
        L_out = (L + 2 * P - K) // S + 1
        Pout, Lp = 1, L_out
        if S == 1:
            Pin, Lin = 1, L + 2 * P
            xp = jnp.pad(x, ((0, 0), (0, 0), (P, P)))[:, None]
            taps = [(0, 0, k, k) for k in range(K)]
            w_list = [weight[:, :, k] for k in range(K)]
        else:
            # Polyphase over the input: xp[n, p, c, m] = x_pad[n, c, m*S + p].
            Pin = S
            taps, w_list = [], []
            for p in range(S):
                j = 0
                while j * S + p < K:
                    taps.append((0, p, j, len(w_list)))
                    w_list.append(weight[:, :, j * S + p])
                    j += 1
            max_off = max(t[2] for t in taps)
            Lin = max(L_out + max_off, -(-(L + P) // S))
            x_pad = jnp.pad(x, ((0, 0), (0, 0), (P, Lin * S - L - P)))
            xp = x_pad.reshape(N, C_in, Lin, S).transpose(0, 3, 1, 2)
    else:
        # nn.ConvTranspose1d weight: (C_in, C_out, K), padding=K//2,
        # output_padding=S//2.  Polyphase: output phase r is a stride-1 conv of
        # the ORIGINAL x with sub-kernel wf[k0(r)::S] (wf = flipped, transposed
        # kernel) -- no zero-insertion, no S x wasted bytes/FLOPs.
        C_out = weight.shape[1]
        OP = S // 2
        L_out = (L - 1) * S - 2 * P + K + OP
        Pin, Pout = 1, S
        Lp = -(-L_out // S)
        taps, w_list = [], []
        for r in range(S):
            k0 = (K - 1 - P - r) % S
            d0 = (r + k0 - (K - 1 - P)) // S
            j = 0
            while k0 + j * S < K:
                taps.append((r, 0, d0 + j, len(w_list)))
                w_list.append(weight[:, :, K - 1 - (k0 + j * S)].T)
                j += 1
        if not taps:  # degenerate stride > kernel_size: all-zero conv output
            taps = [(0, 0, 0, 0)]
            w_list = [jnp.zeros_like(weight[:, :, 0].T)]
        pad_left = max(0, -min(t[2] for t in taps))
        taps = [(r, p, off + pad_left, wi) for (r, p, off, wi) in taps]
        max_off = max(t[2] for t in taps)
        Lin = max(max_off + Lp, L + pad_left)
        xp = jnp.pad(x, ((0, 0), (0, 0), (pad_left, Lin - L - pad_left)))[:, None]

    xp = xp.astype(compute_dtype)
    w_arr = jnp.stack(w_list, axis=0).astype(compute_dtype)       # (T, C_out, C_in)
    T = w_arr.shape[0]
    Lin = xp.shape[-1]
    gamma = gamma.astype(jnp.float32)
    beta = beta.astype(jnp.float32)

    # ---- batch tiling: biggest divisor of N under a multi-MiB VMEM budget ----
    per_b = (Pin * C_in * Lin * jnp.dtype(compute_dtype).itemsize
             + 5 * Pout * C_out * Lp * 4)            # x block + y/out + headroom
    B_tile = _pick_batch_tile(N, per_b)
    n_tiles = N // B_tile
    n_per_tile = B_tile * L_out                      # valid elems per channel per tile
    compute_y = _make_compute_y(taps, B_tile, Pout, C_out, Lp)

    x_spec = pl.BlockSpec((B_tile, Pin, C_in, Lin), lambda i: (i, 0, 0, 0))
    w_spec = pl.BlockSpec((T, C_out, C_in), lambda i: (0, 0, 0))
    stat_spec = pl.BlockSpec((1, 1, C_out), lambda i: (i, 0, 0))
    vec_spec = pl.BlockSpec((1, C_out), lambda i: (0, 0))
    out_spec = pl.BlockSpec((B_tile, Pout, C_out, Lp), lambda i: (i, 0, 0, 0))
    cparams = pltpu.CompilerParams(dimension_semantics=("parallel",),
                                   vmem_limit_bytes=_vmem_limit_bytes())

    # ---- phase 1: per-tile partial BN stats (parallel grid) ----
    q = L_out % S if (deconv and L_out % S != 0) else 0
    tail_mask = (q, Lp) if q else None
    s1, m2 = pl.pallas_call(
        _make_stats_kernel(compute_y, 1.0 / n_per_tile, tail_mask),
        grid=(n_tiles,),
        in_specs=[x_spec, w_spec],
        out_specs=[stat_spec, stat_spec],
        out_shape=[jax.ShapeDtypeStruct((n_tiles, 1, C_out), jnp.float32)] * 2,
        compiler_params=cparams,
    )(xp, w_arr)

    # ---- combine per-tile stats (Chan's parallel variance; tiny f32 math) ----
    s1 = s1[:, 0, :]                                  # (n_tiles, C_out)
    m2 = m2[:, 0, :]
    n_total = N * L_out
    mean_t = s1 / n_per_tile
    mean = jnp.sum(s1, axis=0) / n_total
    m2_tot = jnp.sum(m2, axis=0) + n_per_tile * jnp.sum((mean_t - mean) ** 2, axis=0)
    var = m2_tot / n_total                            # biased, as in BatchNorm1d (train)
    scale = gamma * lax.rsqrt(var + _BN_EPS)
    shift = beta - mean * scale

    # ---- phase 2: recompute conv + folded BN FMA + ReLU, NCL-layout output ----
    y_out = pl.pallas_call(
        _make_apply_kernel(compute_y),
        grid=(n_tiles,),
        in_specs=[x_spec, w_spec, vec_spec, vec_spec],
        out_specs=out_spec,
        out_shape=jax.ShapeDtypeStruct((N, Pout, C_out, Lp), jnp.float32),
        compiler_params=cparams,
    )(xp, w_arr, scale[None, :], shift[None, :])

    if Pout == 1:
        return y_out[:, 0]
    # Interleave the S deconv output phases: y[:, :, r::S] = phase r (tiny pass).
    return y_out.transpose(0, 2, 3, 1).reshape(N, C_out, Lp * Pout)[:, :, :L_out]


# ------------------------------ pure-JAX reference ---------------------------
def _bn_relu_ref(y, gamma, beta):
    mean = jnp.mean(y, axis=(0, 2), keepdims=True)
    var = jnp.mean(jnp.square(y - mean), axis=(0, 2), keepdims=True)
    y_hat = (y - mean) / jnp.sqrt(var + _BN_EPS)
    return jnp.maximum(y_hat * gamma[None, :, None] + beta[None, :, None], 0.0)


def _conv_ref(x, w, stride, padding):
    return lax.conv_general_dilated(
        x, w, window_strides=(stride,), padding=[(padding, padding)],
        dimension_numbers=("NCH", "OIH", "NCH"))


def _deconv_ref(x, w, stride, padding, output_padding):
    K = w.shape[2]
    w_flip = jnp.flip(w, axis=2).transpose(1, 0, 2)  # (C_out, C_in, K)
    return lax.conv_general_dilated(
        x, w_flip, window_strides=(1,),
        padding=[(K - 1 - padding, K - 1 - padding + output_padding)],
        lhs_dilation=(stride,),
        dimension_numbers=("NCH", "OIH", "NCH"))


# ---------------------------------- main --------------------------------------
if __name__ == "__main__":
    key = jax.random.PRNGKey(0)
    k1, k2, k3 = jax.random.split(key, 3)

    N, C_in, L = 2, 4, 16
    C_out = 8

    x = jax.random.normal(k1, (N, C_in, L), jnp.float32)
    gamma = jnp.ones((C_out,), jnp.float32)   # BatchNorm1d default init (weight=1)
    beta = jnp.zeros((C_out,), jnp.float32)   # BatchNorm1d default init (bias=0)

    # Tolerance covers bf16 MXU operand quantization of the BN-normalized
    # outputs (~1e-2 relative); real bugs are orders of magnitude larger.
    TOL = 4e-2

    # --- conv branch: ConvOrDeconv(4, 8, kernel_size=3, stride=1, deconv=False)
    K, S = 3, 1
    w_conv = 0.1 * jax.random.normal(k2, (C_out, C_in, K), jnp.float32)
    out = conv_or_deconv_forward(x, w_conv, gamma, beta,
                                 kernel_size=K, stride=S, deconv=False)
    jax.block_until_ready(out)
    ref = _bn_relu_ref(_conv_ref(x, w_conv, S, K // 2), gamma, beta)
    assert out.shape == ref.shape == (N, C_out, (L + 2 * (K // 2) - K) // S + 1)
    assert jnp.allclose(out, ref, atol=TOL, rtol=TOL), float(jnp.max(jnp.abs(out - ref)))

    # --- deconv branch: ConvOrDeconv(4, 8, kernel_size=5, stride=2, deconv=True)
    Kd, Sd = 5, 2
    w_dec = 0.1 * jax.random.normal(k3, (C_in, C_out, Kd), jnp.float32)
    out_d = conv_or_deconv_forward(x, w_dec, gamma, beta,
                                   kernel_size=Kd, stride=Sd, deconv=True)
    jax.block_until_ready(out_d)
    ref_d = _bn_relu_ref(_deconv_ref(x, w_dec, Sd, Kd // 2, Sd // 2), gamma, beta)
    assert out_d.shape == ref_d.shape == (N, C_out, (L - 1) * Sd - 2 * (Kd // 2) + Kd + Sd // 2)
    assert jnp.allclose(out_d, ref_d, atol=TOL, rtol=TOL), float(jnp.max(jnp.abs(out_d - ref_d)))

    print("KERNEL_OK")
</pallas_src>

<mosaic_0001>
module attributes {stable_mosaic.version = 11 : i64} {
  func.func @stats_kernel(%arg0: i32, %arg1: memref<2x1x4x18xbf16, #tpu.memory_space<vmem>>, %arg2: memref<3x8x4xbf16, #tpu.memory_space<vmem>>, %arg3: memref<1x1x8xf32, #tpu.memory_space<vmem>>, %arg4: memref<1x1x8xf32, #tpu.memory_space<vmem>>) attributes {dimension_semantics = [#tpu.dimension_semantics<parallel>], iteration_bounds = array<i64: 1>, scalar_prefetch = 0 : i64, scratch_operands = 0 : i64, tpu.core_type = #tpu.core_type<tc>, window_params = [{transform_indices = @transform_0, window_bounds = array<i64: 2, 1, 4, 18>}, {pipeline_mode = #tpu.pipeline_mode<synchronous>, transform_indices = @transform_1, window_bounds = array<i64: 3, 8, 4>}, {transform_indices = @transform_2, window_bounds = array<i64: 1, 1, 8>}, {transform_indices = @transform_3, window_bounds = array<i64: 1, 1, 8>}]} {
    %c0 = arith.constant 0 : index
    %c0_0 = arith.constant 0 : index
    %c0_1 = arith.constant 0 : index
    %c0_2 = arith.constant 0 : index
    %0 = vector.load %arg1[%c0, %c0_0, %c0_1, %c0_2] : memref<2x1x4x18xbf16, #tpu.memory_space<vmem>>, vector<2x1x4x16xbf16>
    %1 = vector.shape_cast %0 : vector<2x1x4x16xbf16> to vector<2x4x16xbf16>
    %c0_3 = arith.constant 0 : index
    %c0_4 = arith.constant 0 : index
    %c0_5 = arith.constant 0 : index
    %2 = vector.load %arg2[%c0_3, %c0_4, %c0_5] : memref<3x8x4xbf16, #tpu.memory_space<vmem>>, vector<1x8x4xbf16>
    %3 = vector.shape_cast %2 : vector<1x8x4xbf16> to vector<8x4xbf16>
    %4 = vector.shape_cast %3 : vector<8x4xbf16> to vector<1x8x4xbf16>
    %5 = vector.shape_cast %4 : vector<1x8x4xbf16> to vector<1x8x4xbf16>
    %6 = vector.broadcast %5 : vector<1x8x4xbf16> to vector<2x8x4xbf16>
    %cst = arith.constant dense<0.000000e+00> : vector<2x8x16xf32>
    %7 = tpu.matmul %6, %1, %cst {dimension_numbers = #tpu.dot_dimension_numbers<[2], [1], [1], [2], [0, 0, 0, 1, 1, 2], [0], [0]>} : vector<2x8x4xbf16>, vector<2x4x16xbf16>, vector<2x8x16xf32> -> vector<2x8x16xf32>
    %c0_6 = arith.constant 0 : index
    %c0_7 = arith.constant 0 : index
    %c0_8 = arith.constant 0 : index
    %c1 = arith.constant 1 : index
    %8 = vector.load %arg1[%c0_6, %c0_7, %c0_8, %c1] : memref<2x1x4x18xbf16, #tpu.memory_space<vmem>>, vector<2x1x4x16xbf16>
    %9 = vector.shape_cast %8 : vector<2x1x4x16xbf16> to vector<2x4x16xbf16>
    %c1_9 = arith.constant 1 : index
    %c0_10 = arith.constant 0 : index
    %c0_11 = arith.constant 0 : index
    %10 = vector.load %arg2[%c1_9, %c0_10, %c0_11] : memref<3x8x4xbf16, #tpu.memory_space<vmem>>, vector<1x8x4xbf16>
    %11 = vector.shape_cast %10 : vector<1x8x4xbf16> to vector<8x4xbf16>
    %12 = vector.shape_cast %11 : vector<8x4xbf16> to vector<1x8x4xbf16>
    %13 = vector.shape_cast %12 : vector<1x8x4xbf16> to vector<1x8x4xbf16>
    %14 = vector.broadcast %13 : vector<1x8x4xbf16> to vector<2x8x4xbf16>
    %cst_12 = arith.constant dense<0.000000e+00> : vector<2x8x16xf32>
    %15 = tpu.matmul %14, %9, %cst_12 {dimension_numbers = #tpu.dot_dimension_numbers<[2], [1], [1], [2], [0, 0, 0, 1, 1, 2], [0], [0]>} : vector<2x8x4xbf16>, vector<2x4x16xbf16>, vector<2x8x16xf32> -> vector<2x8x16xf32>
    %16 = arith.addf %7, %15 : vector<2x8x16xf32>
    %c0_13 = arith.constant 0 : index
    %c0_14 = arith.constant 0 : index
    %c0_15 = arith.constant 0 : index
    %c2 = arith.constant 2 : index
    %17 = vector.load %arg1[%c0_13, %c0_14, %c0_15, %c2] : memref<2x1x4x18xbf16, #tpu.memory_space<vmem>>, vector<2x1x4x16xbf16>
    %18 = vector.shape_cast %17 : vector<2x1x4x16xbf16> to vector<2x4x16xbf16>
    %c2_16 = arith.constant 2 : index
    %c0_17 = arith.constant 0 : index
    %c0_18 = arith.constant 0 : index
    %19 = vector.load %arg2[%c2_16, %c0_17, %c0_18] : memref<3x8x4xbf16, #tpu.memory_space<vmem>>, vector<1x8x4xbf16>
    %20 = vector.shape_cast %19 : vector<1x8x4xbf16> to vector<8x4xbf16>
    %21 = vector.shape_cast %20 : vector<8x4xbf16> to vector<1x8x4xbf16>
    %22 = vector.shape_cast %21 : vector<1x8x4xbf16> to vector<1x8x4xbf16>
    %23 = vector.broadcast %22 : vector<1x8x4xbf16> to vector<2x8x4xbf16>
    %cst_19 = arith.constant dense<0.000000e+00> : vector<2x8x16xf32>
    %24 = tpu.matmul %23, %18, %cst_19 {dimension_numbers = #tpu.dot_dimension_numbers<[2], [1], [1], [2], [0, 0, 0, 1, 1, 2], [0], [0]>} : vector<2x8x4xbf16>, vector<2x4x16xbf16>, vector<2x8x16xf32> -> vector<2x8x16xf32>
    %25 = arith.addf %16, %24 : vector<2x8x16xf32>
    %26 = vector.shape_cast %25 : vector<2x8x16xf32> to vector<2x1x8x16xf32>
    %cst_20 = arith.constant dense<0.000000e+00> : vector<8xf32>
    %27 = vector.multi_reduction <add>, %26, %cst_20 [0, 1, 3] : vector<2x1x8x16xf32> to vector<8xf32>
    %28 = vector.shape_cast %27 : vector<8xf32> to vector<1x1x8x1xf32>
    %cst_21 = arith.constant 3.125000e-02 : f32
    %29 = vector.broadcast %cst_21 : f32 to vector<1x1x8x1xf32>
    %30 = arith.mulf %28, %29 : vector<1x1x8x1xf32>
    %31 = vector.broadcast %30 : vector<1x1x8x1xf32> to vector<2x1x8x16xf32>
    %32 = arith.subf %26, %31 : vector<2x1x8x16xf32>
    %33 = arith.mulf %32, %32 : vector<2x1x8x16xf32>
    %cst_22 = arith.constant dense<0.000000e+00> : vector<8xf32>
    %34 = vector.multi_reduction <add>, %33, %cst_22 [0, 1, 3] : vector<2x1x8x16xf32> to vector<8xf32>
    %35 = vector.shape_cast %34 : vector<8xf32> to vector<1x1x8x1xf32>
    %36 = vector.shape_cast %28 : vector<1x1x8x1xf32> to vector<1x1x8xf32>
    %c0_23 = arith.constant 0 : index
    %c0_24 = arith.constant 0 : index
    %c0_25 = arith.constant 0 : index
    %37 = vector.load %arg3[%c0_23, %c0_24, %c0_25] : memref<1x1x8xf32, #tpu.memory_space<vmem>>, vector<1x1x8xf32>
    tpu.vector_store %arg3[%c0_23, %c0_24, %c0_25], %36 {strides = array<i32>} : memref<1x1x8xf32, #tpu.memory_space<vmem>>, vector<1x1x8xf32>,
    %38 = vector.shape_cast %35 : vector<1x1x8x1xf32> to vector<1x1x8xf32>
    %c0_26 = arith.constant 0 : index
    %c0_27 = arith.constant 0 : index
    %c0_28 = arith.constant 0 : index
    %39 = vector.load %arg4[%c0_26, %c0_27, %c0_28] : memref<1x1x8xf32, #tpu.memory_space<vmem>>, vector<1x1x8xf32>
    tpu.vector_store %arg4[%c0_26, %c0_27, %c0_28], %38 {strides = array<i32>} : memref<1x1x8xf32, #tpu.memory_space<vmem>>, vector<1x1x8xf32>,
    return
  }
  func.func @transform_0(%arg0: i32) -> (i32, i32, i32, i32) {
    %c0_i32 = arith.constant 0 : i32
    %c0_i32_0 = arith.constant 0 : i32
    %c0_i32_1 = arith.constant 0 : i32
    %c0_i32_2 = arith.constant 0 : i32
    return %arg0, %c0_i32, %c0_i32_0, %c0_i32_1 : i32, i32, i32, i32
  }
  func.func @transform_1(%arg0: i32) -> (i32, i32, i32) {
    %c0_i32 = arith.constant 0 : i32
    %c0_i32_0 = arith.constant 0 : i32
    %c0_i32_1 = arith.constant 0 : i32
    %c0_i32_2 = arith.constant 0 : i32
    return %c0_i32, %c0_i32_0, %c0_i32_1 : i32, i32, i32
  }
  func.func @transform_2(%arg0: i32) -> (i32, i32, i32) {
    %c0_i32 = arith.constant 0 : i32
    %c0_i32_0 = arith.constant 0 : i32
    %c0_i32_1 = arith.constant 0 : i32
    return %arg0, %c0_i32, %c0_i32_0 : i32, i32, i32
  }
  func.func @transform_3(%arg0: i32) -> (i32, i32, i32) {
    %c0_i32 = arith.constant 0 : i32
    %c0_i32_0 = arith.constant 0 : i32
    %c0_i32_1 = arith.constant 0 : i32
    return %arg0, %c0_i32, %c0_i32_0 : i32, i32, i32
  }
}

module attributes {stable_mosaic.version = 11 : i64} {
  func.func @apply_kernel(%arg0: i32, %arg1: memref<2x1x4x18xbf16, #tpu.memory_space<vmem>>, %arg2: memref<3x8x4xbf16, #tpu.memory_space<vmem>>, %arg3: memref<1x8xf32, #tpu.memory_space<vmem>>, %arg4: memref<1x8xf32, #tpu.memory_space<vmem>>, %arg5: memref<2x1x8x16xf32, #tpu.memory_space<vmem>>) attributes {dimension_semantics = [#tpu.dimension_semantics<parallel>], iteration_bounds = array<i64: 1>, scalar_prefetch = 0 : i64, scratch_operands = 0 : i64, tpu.core_type = #tpu.core_type<tc>, window_params = [{transform_indices = @transform_0, window_bounds = array<i64: 2, 1, 4, 18>}, {pipeline_mode = #tpu.pipeline_mode<synchronous>, transform_indices = @transform_1, window_bounds = array<i64: 3, 8, 4>}, {pipeline_mode = #tpu.pipeline_mode<synchronous>, transform_indices = @transform_2, window_bounds = array<i64: 1, 8>}, {pipeline_mode = #tpu.pipeline_mode<synchronous>, transform_indices = @transform_3, window_bounds = array<i64: 1, 8>}, {transform_indices = @transform_4, window_bounds = array<i64: 2, 1, 8, 16>}]} {
    %c0 = arith.constant 0 : index
    %c0_0 = arith.constant 0 : index
    %c0_1 = arith.constant 0 : index
    %c0_2 = arith.constant 0 : index
    %0 = vector.load %arg1[%c0, %c0_0, %c0_1, %c0_2] : memref<2x1x4x18xbf16, #tpu.memory_space<vmem>>, vector<2x1x4x16xbf16>
    %1 = vector.shape_cast %0 : vector<2x1x4x16xbf16> to vector<2x4x16xbf16>
    %c0_3 = arith.constant 0 : index
    %c0_4 = arith.constant 0 : index
    %c0_5 = arith.constant 0 : index
    %2 = vector.load %arg2[%c0_3, %c0_4, %c0_5] : memref<3x8x4xbf16, #tpu.memory_space<vmem>>, vector<1x8x4xbf16>
    %3 = vector.shape_cast %2 : vector<1x8x4xbf16> to vector<8x4xbf16>
    %4 = vector.shape_cast %3 : vector<8x4xbf16> to vector<1x8x4xbf16>
    %5 = vector.shape_cast %4 : vector<1x8x4xbf16> to vector<1x8x4xbf16>
    %6 = vector.broadcast %5 : vector<1x8x4xbf16> to vector<2x8x4xbf16>
    %cst = arith.constant dense<0.000000e+00> : vector<2x8x16xf32>
    %7 = tpu.matmul %6, %1, %cst {dimension_numbers = #tpu.dot_dimension_numbers<[2], [1], [1], [2], [0, 0, 0, 1, 1, 2], [0], [0]>} : vector<2x8x4xbf16>, vector<2x4x16xbf16>, vector<2x8x16xf32> -> vector<2x8x16xf32>
    %c0_6 = arith.constant 0 : index
    %c0_7 = arith.constant 0 : index
    %c0_8 = arith.constant 0 : index
    %c1 = arith.constant 1 : index
    %8 = vector.load %arg1[%c0_6, %c0_7, %c0_8, %c1] : memref<2x1x4x18xbf16, #tpu.memory_space<vmem>>, vector<2x1x4x16xbf16>
    %9 = vector.shape_cast %8 : vector<2x1x4x16xbf16> to vector<2x4x16xbf16>
    %c1_9 = arith.constant 1 : index
    %c0_10 = arith.constant 0 : index
    %c0_11 = arith.constant 0 : index
    %10 = vector.load %arg2[%c1_9, %c0_10, %c0_11] : memref<3x8x4xbf16, #tpu.memory_space<vmem>>, vector<1x8x4xbf16>
    %11 = vector.shape_cast %10 : vector<1x8x4xbf16> to vector<8x4xbf16>
    %12 = vector.shape_cast %11 : vector<8x4xbf16> to vector<1x8x4xbf16>
    %13 = vector.shape_cast %12 : vector<1x8x4xbf16> to vector<1x8x4xbf16>
    %14 = vector.broadcast %13 : vector<1x8x4xbf16> to vector<2x8x4xbf16>
    %cst_12 = arith.constant dense<0.000000e+00> : vector<2x8x16xf32>
    %15 = tpu.matmul %14, %9, %cst_12 {dimension_numbers = #tpu.dot_dimension_numbers<[2], [1], [1], [2], [0, 0, 0, 1, 1, 2], [0], [0]>} : vector<2x8x4xbf16>, vector<2x4x16xbf16>, vector<2x8x16xf32> -> vector<2x8x16xf32>
    %16 = arith.addf %7, %15 : vector<2x8x16xf32>
    %c0_13 = arith.constant 0 : index
    %c0_14 = arith.constant 0 : index
    %c0_15 = arith.constant 0 : index
    %c2 = arith.constant 2 : index
    %17 = vector.load %arg1[%c0_13, %c0_14, %c0_15, %c2] : memref<2x1x4x18xbf16, #tpu.memory_space<vmem>>, vector<2x1x4x16xbf16>
    %18 = vector.shape_cast %17 : vector<2x1x4x16xbf16> to vector<2x4x16xbf16>
    %c2_16 = arith.constant 2 : index
    %c0_17 = arith.constant 0 : index
    %c0_18 = arith.constant 0 : index
    %19 = vector.load %arg2[%c2_16, %c0_17, %c0_18] : memref<3x8x4xbf16, #tpu.memory_space<vmem>>, vector<1x8x4xbf16>
    %20 = vector.shape_cast %19 : vector<1x8x4xbf16> to vector<8x4xbf16>
    %21 = vector.shape_cast %20 : vector<8x4xbf16> to vector<1x8x4xbf16>
    %22 = vector.shape_cast %21 : vector<1x8x4xbf16> to vector<1x8x4xbf16>
    %23 = vector.broadcast %22 : vector<1x8x4xbf16> to vector<2x8x4xbf16>
    %cst_19 = arith.constant dense<0.000000e+00> : vector<2x8x16xf32>
    %24 = tpu.matmul %23, %18, %cst_19 {dimension_numbers = #tpu.dot_dimension_numbers<[2], [1], [1], [2], [0, 0, 0, 1, 1, 2], [0], [0]>} : vector<2x8x4xbf16>, vector<2x4x16xbf16>, vector<2x8x16xf32> -> vector<2x8x16xf32>
    %25 = arith.addf %16, %24 : vector<2x8x16xf32>
    %26 = vector.shape_cast %25 : vector<2x8x16xf32> to vector<2x1x8x16xf32>
    %c0_20 = arith.constant 0 : index
    %c0_21 = arith.constant 0 : index
    %27 = vector.load %arg3[%c0_20, %c0_21] : memref<1x8xf32, #tpu.memory_space<vmem>>, vector<1x8xf32>
    %28 = vector.shape_cast %27 : vector<1x8xf32> to vector<1x1x8x1xf32>
    %c0_22 = arith.constant 0 : index
    %c0_23 = arith.constant 0 : index
    %29 = vector.load %arg4[%c0_22, %c0_23] : memref<1x8xf32, #tpu.memory_space<vmem>>, vector<1x8xf32>
    %30 = vector.shape_cast %29 : vector<1x8xf32> to vector<1x1x8x1xf32>
    %31 = vector.broadcast %28 : vector<1x1x8x1xf32> to vector<2x1x8x16xf32>
    %32 = arith.mulf %26, %31 : vector<2x1x8x16xf32>
    %33 = vector.broadcast %30 : vector<1x1x8x1xf32> to vector<2x1x8x16xf32>
    %34 = arith.addf %32, %33 : vector<2x1x8x16xf32>
    %cst_24 = arith.constant 0.000000e+00 : f32
    %35 = vector.broadcast %cst_24 : f32 to vector<2x1x8x16xf32>
    %36 = arith.maximumf %34, %35 : vector<2x1x8x16xf32>
    %c0_25 = arith.constant 0 : index
    %c0_26 = arith.constant 0 : index
    %c0_27 = arith.constant 0 : index
    %c0_28 = arith.constant 0 : index
    %37 = vector.load %arg5[%c0_25, %c0_26, %c0_27, %c0_28] : memref<2x1x8x16xf32, #tpu.memory_space<vmem>>, vector<2x1x8x16xf32>
    tpu.vector_store %arg5[%c0_25, %c0_26, %c0_27, %c0_28], %36 {strides = array<i32>} : memref<2x1x8x16xf32, #tpu.memory_space<vmem>>, vector<2x1x8x16xf32>,
    return
  }
  func.func @transform_0(%arg0: i32) -> (i32, i32, i32, i32) {
    %c0_i32 = arith.constant 0 : i32
    %c0_i32_0 = arith.constant 0 : i32
    %c0_i32_1 = arith.constant 0 : i32
    %c0_i32_2 = arith.constant 0 : i32
    return %arg0, %c0_i32, %c0_i32_0, %c0_i32_1 : i32, i32, i32, i32
  }
  func.func @transform_1(%arg0: i32) -> (i32, i32, i32) {
    %c0_i32 = arith.constant 0 : i32
    %c0_i32_0 = arith.constant 0 : i32
    %c0_i32_1 = arith.constant 0 : i32
    %c0_i32_2 = arith.constant 0 : i32
    return %c0_i32, %c0_i32_0, %c0_i32_1 : i32, i32, i32
  }
  func.func @transform_2(%arg0: i32) -> (i32, i32) {
    %c0_i32 = arith.constant 0 : i32
    %c0_i32_0 = arith.constant 0 : i32
    %c0_i32_1 = arith.constant 0 : i32
    return %c0_i32, %c0_i32_0 : i32, i32
  }
  func.func @transform_3(%arg0: i32) -> (i32, i32) {
    %c0_i32 = arith.constant 0 : i32
    %c0_i32_0 = arith.constant 0 : i32
    %c0_i32_1 = arith.constant 0 : i32
    return %c0_i32, %c0_i32_0 : i32, i32
  }
  func.func @transform_4(%arg0: i32) -> (i32, i32, i32, i32) {
    %c0_i32 = arith.constant 0 : i32
    %c0_i32_0 = arith.constant 0 : i32
    %c0_i32_1 = arith.constant 0 : i32
    %c0_i32_2 = arith.constant 0 : i32
    return %arg0, %c0_i32, %c0_i32_0, %c0_i32_1 : i32, i32, i32, i32
  }
}

</mosaic_0001>

<bundles_post_ra>
// kernel: conv_or_deconv_forward.2
= control target key start
LH: loop header
LB: loop body
LE: loop exit
PB: predicated region body
PF: predicated region fallthrough
CT: control target
= control target key end

     0   :  { %s199_s16 = smov 127   ;;  %s200_s21 = smov 126   ;;  %vm29_vm0 = vcmask 1041408   ;;  %vm25_vm1 = vcmask 31744   ;;  %vm154_vm2 = vcmask 130048   ;;  %v171_v40 = vlaneseq  ;;  %s266_s0 = inlined_call_operand.vmem [shape: bf16[2,1,4,18], index: 0, kind: input, shape index: {}]   ;;  %s267_s1 = inlined_call_operand.vmem [shape: bf16[3,8,4], index: 1, kind: input, shape index: {}]   ;;  %s268_s2 = inlined_call_operand.vmem [shape: f32[1,1,8], index: 2, kind: output, shape index: {0}]   ;;  %s269_s3 = inlined_call_operand.vmem [shape: f32[1,1,8], index: 3, kind: output, shape index: {1}]  }
   0x1   :  { %v14_v0 = vld [vmem:[%s266_s0] sm:$0x3]  ;;  %v15_v1 = vld [vmem:[%s266_s0 + $0x2] sm:$0x3]  ;;  %v189_v13 = vld [vmem:[%s267_s1 + $0x4] sm:$0xf] }
   0x2   :  { %20 = vst [vmem:[#allocation1] ss:$4 sm:$0xff] %v14_v0  ;;  %v101_v3 = vld [vmem:[%s266_s0] sm:$0x3]  ;;  %v102_v5 = vld [vmem:[%s266_s0 + $0x2] sm:$0x3] }
   0x3   :  { %v71_v8 = vsel %vm29_vm0, %v14_v0, 0  ;;  %v86_v9 = vsel %vm29_vm0, %v15_v1, 0  ;;  %v16_v10 = vld [vmem:[%s267_s1] sm:$0xf]  ;;  %v194_v18 = vld [vmem:[%s267_s1 + $0x8] sm:$0xf] }
   0x4   :  { %80 = vmatpush.bf16.msra.mxu2 %v71_v8  ;;  %95 = vmatpush.bf16.msra.mxu3 %v86_v9  ;;  %v172_v41 = vand.u32 127, %v171_v40  ;;  %vm175_vm3 = vcmask 57344  }
   0x7   :  { %192 = vmatmul.msk.bf16.vlgmr.msra.gmra.mxu2 %vm25_vm1, %v16_v10  ;;  %193 = vmatmul.msk.bf16.vlgmr.msra.gmra.mxu3 %vm25_vm1, %v16_v10 }
   0x9   :  { %v21_v2 = vld.sshfl [vmem:[#allocation1] sm:$0xff pattern:$0x73625140] }
   0xa   :  { %23 = vrot.lane.b32.xlu0 %v21_v2, %s199_s16  ;;  %47 = vst [vmem:[#allocation1] ss:$4 sm:$0xff] %v15_v1 }
  0x11   :  { %v48_v4 = vld.sshfl [vmem:[#allocation1] sm:$0xff pattern:$0x73625140] }
  0x12   :  { %50 = vrot.lane.b32.xlu0 %v48_v4, %s199_s16  ;;  %106 = vst [vmem:[#allocation1] ss:$4 sm:$0xff] %v101_v3 }
  0x19   :  { %v107_v6 = vld.sshfl [vmem:[#allocation1] sm:$0xff pattern:$0x73625140] }
  0x1a   :  { %109 = vrot.lane.b32.xlu1 %v107_v6, %s200_s21  ;;  %131 = vst [vmem:[#allocation1] ss:$4 sm:$0xff] %v102_v5 }
  0x21   :  { %v132_v7 = vld.sshfl [vmem:[#allocation1] sm:$0xff pattern:$0x73625140] }
  0x22   :  { %134 = vrot.lane.b32.xlu1 %v132_v7, %s200_s21 }
  0x7c   :  { %v24_v11 = vpop.permute.xlu0 %23 }
  0x7d   :  { %v31_v12 = vsel %vm29_vm0, %v24_v11, 0 }
  0x7e   :  { %40 = vmatpush.bf16.msra.mxu0 %v31_v12 }
  0x81   :  { %190 = vmatmul.msk.bf16.vlgmr.msra.gmra.mxu0 %vm25_vm1, %v189_v13 }
  0x84   :  { %v51_v14 = vpop.permute.xlu0 %50 }
  0x85   :  { %v53_v15 = vsel %vm29_vm0, %v51_v14, 0 }
  0x86   :  { %62 = vmatpush.bf16.msra.mxu1 %v53_v15 }
  0x89   :  { %191 = vmatmul.msk.bf16.vlgmr.msra.gmra.mxu1 %vm25_vm1, %v189_v13 }
  0x8a   :  { %v82_v21 = vpop.f32.mrf.mxu2  ;;  %v97_v22 = vpop.f32.mrf.mxu3 }
  0x8c   :  { %v110_v16 = vpop.permute.xlu1 %109 }
  0x8d   :  { %v115_v17 = vsel %vm29_vm0, %v110_v16, 0 }
  0x8e   :  { %124 = vmatpush.bf16.msrb.mxu0 %v115_v17 }
  0x91   :  { %195 = vmatmul.msk.bf16.vlgmr.msrb.gmra.mxu0 %vm25_vm1, %v194_v18 }
  0x92   :  { %v84_v23 = vpop.f32.mrf.mxu2  ;;  %v99_v24 = vpop.f32.mrf.mxu3 }
  0x94   :  { %v135_v19 = vpop.permute.xlu1 %134 }
  0x95   :  { %v137_v20 = vsel %vm29_vm0, %v135_v19, 0 }
  0x96   :  { %146 = vmatpush.bf16.msrb.mxu1 %v137_v20 }
  0x99   :  { %196 = vmatmul.msk.bf16.vlgmr.msrb.gmra.mxu1 %vm25_vm1, %v194_v18 }
  0xfe   :  { %v42_v25 = vpop.f32.mrf.mxu0 }
  0xff   :  { %v83_v30 = vadd.f32 %v82_v21, %v42_v25 }
 0x106   :  { %v64_v26 = vpop.f32.mrf.mxu1  ;;  %v44_v27 = vpop.f32.mrf.mxu0 }
 0x107   :  { %v98_v31 = vadd.f32 %v97_v22, %v64_v26 }
 0x10e   :  { %v66_v28 = vpop.f32.mrf.mxu1  ;;  %v126_v29 = vpop.f32.mrf.mxu0 }
 0x10f   :  { %v152_v32 = vadd.f32 %v126_v29, %v83_v30 }
 0x111   :  { %v155_v36 = vsel %vm154_vm2, %v152_v32, 0.0 }
 0x116   :  { %v148_v33 = vpop.f32.mrf.mxu1  ;;  %v128_v34 = vpop.f32.mrf.mxu0 }
 0x117   :  { %v153_v35 = vadd.f32 %v148_v33, %v98_v31 }
 0x119   :  { %v156_v37 = vsel %vm154_vm2, %v153_v35, 0.0 }
 0x11a   :  { %v157_v38 = vadd.f32 %v156_v37, %v155_v36 }
 0x11c   :  { %158 = vadd.xlane.f32.xlu2 %v157_v38 }
 0x11e   :  { %v150_v39 = vpop.f32.mrf.mxu1 }
 0x18f   :  { %v159_v42 = vpop.xlane.xlu2 %158 }
 0x190   :  { %v160_v43 = vmul.f32 0.03125, %v159_v42  ;;  %v173_v44 = vperm.slane %v159_v42, %v172_v41 }
 0x192   :  { %v161_v45 = vsub.f32 %v152_v32, %v160_v43  ;;  %v162_v46 = vsub.f32 %v153_v35, %v160_v43  ;;  %176 = vst.msk [vmem:[%s268_s2] sm:$0x1] %vm175_vm3, %v173_v44 }
 0x194   :  { %v163_v47 = vmul.f32 %v161_v45, %v161_v45  ;;  %v164_v48 = vmul.f32 %v162_v46, %v162_v46 }
 0x196   :  { %v165_v49 = vsel %vm154_vm2, %v163_v47, 0.0  ;;  %v166_v50 = vsel %vm154_vm2, %v164_v48, 0.0 }
 0x197   :  { %v167_v51 = vadd.f32 %v166_v50, %v165_v49 }
 0x199   :  { %168 = vadd.xlane.f32.xlu2 %v167_v51 }
 0x20c   :  { %v169_v52 = vpop.xlane.xlu2 %168 }
 0x20d   :  { %v178_v53 = vperm.slane %v169_v52, %v172_v41 }
 0x20f   :  { %180 = vst.msk [vmem:[%s269_s3] sm:$0x1] %vm175_vm3, %v178_v53 }

// kernel: conv_or_deconv_forward.3
= control target key start
LH: loop header
LB: loop body
LE: loop exit
PB: predicated region body
PF: predicated region fallthrough
CT: control target
= control target key end

     0   :  { %s319_s0 = inlined_call_operand.vmem [shape: bf16[2,1,4,18], index: 0, kind: input, shape index: {}]   ;;  %s320_s1 = inlined_call_operand.vmem [shape: bf16[3,8,4], index: 1, kind: input, shape index: {}]   ;;  %s321_s2 = inlined_call_operand.vmem [shape: f32[1,8], index: 2, kind: input, shape index: {}]   ;;  %s322_s3 = inlined_call_operand.vmem [shape: f32[1,8], index: 3, kind: input, shape index: {}]   ;;  %s323_s4 = inlined_call_operand.hbm [shape: f32[2,1,8,16], index: 4, kind: output, shape index: {}]  }
   0x1   :  { %v19_v0 = vld [vmem:[%s319_s0] sm:$0x3] }
   0x2   :  { %25 = vst [vmem:[#allocation1] ss:$4 sm:$0xff] %v19_v0 }
   0x3   :  { %9 = vsyncpa [#allocation3], 0  ;;  %v20_v1 = vld [vmem:[%s319_s0 + $0x2] sm:$0x3]  ;;  %s245_s19 = smov 127   ;;  %s246_s24 = smov 126   ;;  %v161_v11 = vlaneseq }
   0x4   :  { %v106_v3 = vld [vmem:[%s319_s0] sm:$0x3]  ;;  %v107_v5 = vld [vmem:[%s319_s0 + $0x2] sm:$0x3]  ;;  %vm34_vm0 = vcmask 1041408   ;;  %vm30_vm1 = vcmask 31744  }
   0x5   :  { %v76_v8 = vsel %vm34_vm0, %v19_v0, 0  ;;  %v91_v9 = vsel %vm34_vm0, %v20_v1, 0  ;;  %v21_v10 = vld [vmem:[%s320_s1] sm:$0xf]  ;;  %v162_v12 = vshrl.u32 %v161_v11, 7  ;;  %vm181_vm2 = vcmask 130048  }
   0x6   :  { %85 = vmatpush.bf16.msra.mxu2 %v76_v8  ;;  %100 = vmatpush.bf16.msra.mxu3 %v91_v9  ;;  %v202_v15 = vld [vmem:[%s320_s1 + $0x4] sm:$0xf]  ;;  %v217_v16 = vld [vmem:[%s321_s2] ss:$0 sm:$0xff]  ;;  %v207_v22 = vld [vmem:[%s320_s1 + $0x8] sm:$0xf] }
   0x7   :  { %215 = vset.pattern.permute.xlu2 %v162_v12  ;;  %216 = vset.pattern.permute.xlu0 %v162_v12  ;;  %v218_v19 = vld [vmem:[%s322_s3] ss:$0 sm:$0xff]  ;;  %s247_s1 = smov [#allocation2]   ;;  %s190_s9 = sshll.u32 %s323_s4, 4  ;;  %s191_s9 = int_to_ptr.hbm [resolvable:$true] %s190_s9 }
   0x8   :  { %s188_s2 = sshll.u32 %s247_s1, 4  ;;  %s248_s10 = smov 128   ;;  %s189_s2 = int_to_ptr.vmem [resolvable:$true] %s188_s2 }
   0x9   :  { %v26_v2 = vld.sshfl [vmem:[#allocation1] sm:$0xff pattern:$0x73625140]  ;;  %205 = vmatmul.msk.bf16.vlgmr.msra.gmra.mxu2 %vm30_vm1, %v21_v10  ;;  %206 = vmatmul.msk.bf16.vlgmr.msra.gmra.mxu3 %vm30_vm1, %v21_v10  ;;  %s249_s11 = smov 8  }
   0xa   :  { %28 = vrot.lane.b32.xlu0 %v26_v2, %s245_s19  ;;  %52 = vst [vmem:[#allocation1] ss:$4 sm:$0xff] %v20_v1 }
   0xf   :  { %165 = vperm.xlu2 %215, %v217_v16  }
  0x11   :  { %v53_v4 = vld.sshfl [vmem:[#allocation1] sm:$0xff pattern:$0x73625140] }
  0x12   :  { %55 = vrot.lane.b32.xlu0 %v53_v4, %s245_s19  ;;  %111 = vst [vmem:[#allocation1] ss:$4 sm:$0xff] %v106_v3 }
  0x17   :  { %173 = vperm.xlu2 %215, %v218_v19  }
  0x19   :  { %v112_v6 = vld.sshfl [vmem:[#allocation1] sm:$0xff pattern:$0x73625140] }
  0x1a   :  { %114 = vrot.lane.b32.xlu1 %v112_v6, %s246_s24  ;;  %136 = vst [vmem:[#allocation1] ss:$4 sm:$0xff] %v107_v5 }
  0x21   :  { %v137_v7 = vld.sshfl [vmem:[#allocation1] sm:$0xff pattern:$0x73625140] }
  0x22   :  { %139 = vrot.lane.b32.xlu1 %v137_v7, %s246_s24 }
  0x69   :  { %v166_v30 = vpop.permute.xlu2 %165 }
  0x71   :  { %v174_v37 = vpop.permute.xlu2 %173 }
  0x7c   :  { %v29_v13 = vpop.permute.xlu0 %28 }
  0x7d   :  { %v36_v14 = vsel %vm34_vm0, %v29_v13, 0 }
  0x7e   :  { %45 = vmatpush.bf16.msra.mxu0 %v36_v14 }
  0x81   :  { %203 = vmatmul.msk.bf16.vlgmr.msra.gmra.mxu0 %vm30_vm1, %v202_v15 }
  0x84   :  { %v56_v17 = vpop.permute.xlu0 %55 }
  0x85   :  { %v58_v18 = vsel %vm34_vm0, %v56_v17, 0 }
  0x86   :  { %67 = vmatpush.bf16.msra.mxu1 %v58_v18 }
  0x89   :  { %204 = vmatmul.msk.bf16.vlgmr.msra.gmra.mxu1 %vm30_vm1, %v202_v15 }
  0x8c   :  { %v115_v20 = vpop.permute.xlu1 %114  ;;  %v87_v25 = vpop.f32.mrf.mxu2 }
  0x8d   :  { %v120_v21 = vsel %vm34_vm0, %v115_v20, 0  ;;  %v102_v26 = vpop.f32.mrf.mxu3 }
  0x8e   :  { %129 = vmatpush.bf16.msrb.mxu0 %v120_v21 }
  0x91   :  { %208 = vmatmul.msk.bf16.vlgmr.msrb.gmra.mxu0 %vm30_vm1, %v207_v22 }
  0x94   :  { %v140_v23 = vpop.permute.xlu1 %139  ;;  %v89_v27 = vpop.f32.mrf.mxu2 }
  0x95   :  { %v142_v24 = vsel %vm34_vm0, %v140_v23, 0  ;;  %v104_v28 = vpop.f32.mrf.mxu3 }
  0x96   :  { %151 = vmatpush.bf16.msrb.mxu1 %v142_v24 }
  0x99   :  { %209 = vmatmul.msk.bf16.vlgmr.msrb.gmra.mxu1 %vm30_vm1, %v207_v22 }
  0xfe   :  { %v47_v29 = vpop.f32.mrf.mxu0 }
  0xff   :  { %v88_v33 = vadd.f32 %v87_v25, %v47_v29 }
 0x106   :  { %v69_v31 = vpop.f32.mrf.mxu1  ;;  %v49_v32 = vpop.f32.mrf.mxu0 }
 0x107   :  { %v103_v40 = vadd.f32 %v102_v26, %v69_v31 }
 0x10e   :  { %v71_v34 = vpop.f32.mrf.mxu1  ;;  %v131_v35 = vpop.f32.mrf.mxu0 }
 0x10f   :  { %v157_v36 = vadd.f32 %v131_v35, %v88_v33 }
 0x111   :  { %v175_v38 = vmul.f32 %v166_v30, %v157_v36 }
 0x113   :  { %v177_v39 = vadd.f32 %v175_v38, %v174_v37 }
 0x115   :  { %v179_v41 = vmax.f32 %v177_v39, 0.0 }
 0x116   :  { %v153_v42 = vpop.f32.mrf.mxu1  ;;  %v133_v43 = vpop.f32.mrf.mxu0 }
 0x117   :  { %v158_v44 = vadd.f32 %v153_v42, %v103_v40  ;;  %182 = vst.msk [vmem:[#allocation2] sm:$0xff] %vm181_vm2, %v179_v41 }
 0x119   :  { %v176_v45 = vmul.f32 %v166_v30, %v158_v44 }
 0x11b   :  { %v178_v46 = vadd.f32 %v176_v45, %v174_v37 }
 0x11d   :  { %v180_v47 = vmax.f32 %v178_v46, 0.0 }
 0x11e   :  { %v155_v48 = vpop.f32.mrf.mxu1 }
 0x11f   :  { %183 = vst.msk [vmem:[#allocation2 + $0x8] sm:$0xff] %vm181_vm2, %v180_v47 }
 0x120   :  { %196 = dma.vmem_to_hbm [thread:$0]  %s189_s2, 256, %s191_s9, [#allocation3], %s248_s10, %s248_s10, %s249_s11  }
 0x121   :  { %243 = dma.done.wait [#allocation3], 256  }
 0x122   :  { %244 = vsyncadd [#allocation3], 4294967040 }
 0x123   :  { %201 = vsyncpa [#allocation3], 1 }

</bundles_post_ra>
